<compile_context>
chip_gen: v7x
topology: tpu7x:2x2x1
jax: 0.10.0
libtpu: 0.0.40
codegen_flags: <defaults>
</compile_context>

<pallas_src>
import jax
import jax.numpy as jnp
from jax.experimental import pallas as pl
from jax.experimental.pallas import tpu as pltpu


def _fused_conv_ps_kernel(x_ref, w_ref, o_ref, xp_ref):
    # x_ref : (BB, H, W*Cin)        batch-block of inputs, (w, ci) on the lanes
    # w_ref : (3*W*Cin, 4*W*C_ps)   resident block-Toeplitz, PS-fused weight
    # o_ref : (BB, H, 4*W*C_ps)     pixel-shuffled output rows (lane-dense)
    # xp_ref: (BB*(H+2), W*Cin)     H-padded scratch (one (H+2)-row slab / image)
    BB, H, NOUT = o_ref.shape
    WC = xp_ref.shape[1]
    Hp = H + 2

    zero_row = jnp.zeros((1, WC), dtype=xp_ref.dtype)
    for i in range(BB):
        r0 = i * Hp
        # H-boundary zeros (W-boundary zeros are folded into the Toeplitz
        # weight).  Kept unconditional: a pl.when(program_id==0) guard breaks
        # when the batch-block axis is split across TensorCores.
        xp_ref[r0:r0 + 1, :] = zero_row
        xp_ref[r0 + H + 1:r0 + H + 2, :] = zero_row
        xp_ref[r0 + 1:r0 + H + 1, :] = x_ref[i]

    # ONE MXU dot with K = 3*W*Cin: the three kh taps are the three
    # sublane-shifted views of the padded scratch, lane-concatenated; the kw
    # taps + W zero-padding live in the block-Toeplitz weight rows.
    M = BB * Hp - 2
    lhs = jnp.concatenate(
        [xp_ref[0:M, :], xp_ref[1:M + 1, :], xp_ref[2:M + 2, :]], axis=1)
    acc = jnp.dot(lhs, w_ref[...], preferred_element_type=jnp.float32)

    # acc rows i*Hp .. i*Hp+H-1 are image i's conv+PixelShuffle output
    # (columns already ordered (i, w, j, c)); the 2 rows at each batch seam
    # are discarded.  Every store is lane-dense (NOUT = 4*W*C_ps >= 256).
    for i in range(BB):
        o_ref[i] = acc[i * Hp:i * Hp + H].astype(o_ref.dtype)


def _fused_conv_ps_pallas(x2d, bw, nb_blocks):
    """x2d: (B, H, W*Cin) f32;  bw: (3*W*Cin, 4*W*C_ps) f32."""
    B, H, WC = x2d.shape
    K3, NOUT = bw.shape
    assert B % nb_blocks == 0
    BB = B // nb_blocks
    Hp = H + 2

    # VMEM budget derived from the actual blocks (double-buffered inputs and
    # outputs, the padded scratch, plus the lhs-concat / f32-acc temporaries),
    # with 2x headroom and a 4 MiB floor.  Portable across 128 MiB (v5e/v6e)
    # and 64 MiB (v7x) parts.
    itemsize = 4
    in_blk = BB * H * WC * itemsize
    w_blk = K3 * NOUT * itemsize
    out_blk = BB * H * NOUT * itemsize
    scratch = BB * Hp * WC * itemsize
    interm = BB * Hp * (K3 + NOUT) * itemsize
    needed = 2 * (in_blk + w_blk + out_blk) + scratch + interm
    vmem_limit = int(max(4 << 20, 2 * needed))

    return pl.pallas_call(
        _fused_conv_ps_kernel,
        out_shape=jax.ShapeDtypeStruct((B, H, NOUT), x2d.dtype),
        grid_spec=pltpu.PrefetchScalarGridSpec(
            num_scalar_prefetch=0,
            grid=(nb_blocks,),
            in_specs=[
                pl.BlockSpec((BB, H, WC), lambda nb: (nb, 0, 0)),
                # Constant index_map -> weight stays resident across steps.
                pl.BlockSpec((K3, NOUT), lambda nb: (0, 0)),
            ],
            out_specs=pl.BlockSpec((BB, H, NOUT), lambda nb: (nb, 0, 0)),
            scratch_shapes=[pltpu.VMEM((BB * Hp, WC), jnp.float32)],
        ),
        compiler_params=pltpu.CompilerParams(
            dimension_semantics=("parallel",),
            vmem_limit_bytes=vmem_limit),
    )(x2d, bw)


def _build_toeplitz_ps_weight(weight, W):
    """OIHW conv weight -> block-Toeplitz, PixelShuffle-fused RHS.

    weight: (Cout=4*C_ps, Cin, 3, 3) with PixelShuffle channel order
            co = c*4 + i*2 + j  (r = 2).
    Returns bw: (3*W*Cin, 4*W*C_ps) with
      bw[kh*(W*Cin) + q*Cin + ci, i*(2*W*C_ps) + w*(2*C_ps) + j*C_ps + c]
        = weight[c*4+i*2+j, ci, kh, kw]   if q == w + kw - 1 (in range), else 0.
    The kw taps and the W zero-padding are both encoded in the Toeplitz bands.
    Called ONCE at parameter-load time (not in the per-call forward path).
    """
    Cout, Cin, _, _ = weight.shape
    C_ps = Cout // 4
    # (c, i, j, ci, kh, kw) -> (kh, kw, ci, i, j, c)
    w6 = weight.reshape(C_ps, 2, 2, Cin, 3, 3)
    wp = jnp.transpose(w6, (4, 5, 3, 1, 2, 0))
    # Selection bands: Sel[kw, q, w] = 1 iff q == w + kw - 1 (inside [0, W)).
    q = jnp.arange(W)[None, :, None]
    wv = jnp.arange(W)[None, None, :]
    kw = jnp.arange(3)[:, None, None]
    sel = (q == (wv + kw - 1)).astype(weight.dtype)          # (3, W, W)
    # bw6[kh, q, ci, i, w, j, c]
    bw6 = jnp.einsum('kqw,hkmijc->hqmiwjc', sel, wp)
    return bw6.reshape(3 * W * Cin, 4 * W * C_ps)


def make_upsample_forward(weight, H, W, *, batch_blocks=None):
    """Build the fused Upsample forward; the weight is preprocessed once here.

    weight: (2*n_feat, n_feat, 3, 3) float32, PyTorch OIHW layout.
    Returned fn: x (B, H*W, n_feat) -> (B, (2H)*(2W), n_feat//2).
    """
    Cout, Cin = weight.shape[0], weight.shape[1]
    C_ps = Cout // 4
    bw = jax.device_put(_build_toeplitz_ps_weight(weight, W))  # built ONCE

    def fwd(x):
        B, L, C = x.shape
        assert L == H * W and C == Cin
        if batch_blocks is not None:
            nb = batch_blocks
        else:
            # One grid step (max M-fill) by default; keep a 2-way parallel
            # batch-block axis for v7x megacore once B is large enough that
            # halving M does not hurt MXU row utilization.
            nb = 2 if (B >= 8 and B % 2 == 0) else 1
        # b (h w) c -> b h (w c): free reshape, (w, ci) on the lane axis.
        x2d = x.reshape(B, H, W * Cin)
        out = _fused_conv_ps_pallas(x2d, bw, nb)      # (B, H, 4*W*C_ps)
        # Kernel output column order is (i, w, j, c), so flattening over
        # (h, i, w, j) gives exactly row index (2h+i)*(2W) + (2w+j):
        # the final rearrange is a free reshape.
        return out.reshape(B, 4 * H * W, C_ps)

    return jax.jit(fwd)


def _reference_forward(x, H, W, weight):
    """Pure-JAX (XLA) reference mirroring the PyTorch module."""
    B, L, Cin = x.shape
    x_nchw = jnp.transpose(x.reshape(B, H, W, Cin), (0, 3, 1, 2))
    y = jax.lax.conv_general_dilated(
        x_nchw, weight, window_strides=(1, 1), padding=((1, 1), (1, 1)),
        dimension_numbers=("NCHW", "OIHW", "NCHW"))
    # PixelShuffle(2) in NCHW
    B_, C2, H_, W_ = y.shape
    r = 2
    C_ps = C2 // (r * r)
    y = y.reshape(B_, C_ps, r, r, H_, W_)
    y = jnp.transpose(y, (0, 1, 4, 2, 5, 3)).reshape(B_, C_ps, H_ * r, W_ * r)
    # b c h w -> b (h w) c
    return jnp.transpose(y, (0, 2, 3, 1)).reshape(B_, (H_ * r) * (W_ * r), C_ps)


if __name__ == "__main__":
    key = jax.random.PRNGKey(0)
    B, n_feat, H, W = 2, 8, 16, 16

    kx, kw = jax.random.split(key)
    x = jax.random.normal(kx, (B, H * W, n_feat), dtype=jnp.float32)
    # Conv2d(n_feat, 2*n_feat, 3, bias=False) weight, OIHW, deterministic init.
    weight = (jax.random.normal(kw, (2 * n_feat, n_feat, 3, 3),
                                dtype=jnp.float32)
              * (1.0 / (3.0 * 3.0 * n_feat) ** 0.5))

    # Weight preprocessing happens once here, outside the per-call hot path.
    fwd = make_upsample_forward(weight, H, W)
    out = jax.block_until_ready(fwd(x))

    ref = _reference_forward(x, H, W, weight)
    assert out.shape == (B, (2 * H) * (2 * W), n_feat // 2), out.shape
    assert jnp.allclose(out, ref, atol=1e-4, rtol=1e-4), float(
        jnp.max(jnp.abs(out - ref)))

    print("KERNEL_OK")
</pallas_src>

<mosaic_0001>
module attributes {stable_mosaic.version = 11 : i64} {
  func.func @_fused_conv_ps_kernel(%arg0: i32, %arg1: memref<2x16x128xf32, #tpu.memory_space<vmem>>, %arg2: memref<384x256xf32, #tpu.memory_space<vmem>>, %arg3: memref<2x16x256xf32, #tpu.memory_space<vmem>>, %arg4: memref<36x128xf32, #tpu.memory_space<vmem>>) attributes {dimension_semantics = [#tpu.dimension_semantics<parallel>], iteration_bounds = array<i64: 1>, scalar_prefetch = 0 : i64, scratch_operands = 1 : i64, tpu.core_type = #tpu.core_type<tc>, window_params = [{transform_indices = @transform_0, window_bounds = array<i64: 2, 16, 128>}, {pipeline_mode = #tpu.pipeline_mode<synchronous>, transform_indices = @transform_1, window_bounds = array<i64: 384, 256>}, {transform_indices = @transform_2, window_bounds = array<i64: 2, 16, 256>}]} {
    %cst = arith.constant 0.000000e+00 : f32
    %0 = vector.broadcast %cst : f32 to vector<1x128xf32>
    %c0 = arith.constant 0 : index
    %c0_0 = arith.constant 0 : index
    %1 = vector.load %arg4[%c0, %c0_0] : memref<36x128xf32, #tpu.memory_space<vmem>>, vector<1x128xf32>
    tpu.vector_store %arg4[%c0, %c0_0], %0 {strides = array<i32>} : memref<36x128xf32, #tpu.memory_space<vmem>>, vector<1x128xf32>,
    %c17 = arith.constant 17 : index
    %c0_1 = arith.constant 0 : index
    %2 = vector.load %arg4[%c17, %c0_1] : memref<36x128xf32, #tpu.memory_space<vmem>>, vector<1x128xf32>
    tpu.vector_store %arg4[%c17, %c0_1], %0 {strides = array<i32>} : memref<36x128xf32, #tpu.memory_space<vmem>>, vector<1x128xf32>,
    %c0_2 = arith.constant 0 : index
    %c0_3 = arith.constant 0 : index
    %c0_4 = arith.constant 0 : index
    %3 = vector.load %arg1[%c0_2, %c0_3, %c0_4] : memref<2x16x128xf32, #tpu.memory_space<vmem>>, vector<1x16x128xf32>
    %4 = vector.shape_cast %3 : vector<1x16x128xf32> to vector<16x128xf32>
    %c1 = arith.constant 1 : index
    %c0_5 = arith.constant 0 : index
    %5 = vector.load %arg4[%c1, %c0_5] : memref<36x128xf32, #tpu.memory_space<vmem>>, vector<16x128xf32>
    tpu.vector_store %arg4[%c1, %c0_5], %4 {strides = array<i32>} : memref<36x128xf32, #tpu.memory_space<vmem>>, vector<16x128xf32>,
    %c18 = arith.constant 18 : index
    %c0_6 = arith.constant 0 : index
    %6 = vector.load %arg4[%c18, %c0_6] : memref<36x128xf32, #tpu.memory_space<vmem>>, vector<1x128xf32>
    tpu.vector_store %arg4[%c18, %c0_6], %0 {strides = array<i32>} : memref<36x128xf32, #tpu.memory_space<vmem>>, vector<1x128xf32>,
    %c35 = arith.constant 35 : index
    %c0_7 = arith.constant 0 : index
    %7 = vector.load %arg4[%c35, %c0_7] : memref<36x128xf32, #tpu.memory_space<vmem>>, vector<1x128xf32>
    tpu.vector_store %arg4[%c35, %c0_7], %0 {strides = array<i32>} : memref<36x128xf32, #tpu.memory_space<vmem>>, vector<1x128xf32>,
    %c1_8 = arith.constant 1 : index
    %c0_9 = arith.constant 0 : index
    %c0_10 = arith.constant 0 : index
    %8 = vector.load %arg1[%c1_8, %c0_9, %c0_10] : memref<2x16x128xf32, #tpu.memory_space<vmem>>, vector<1x16x128xf32>
    %9 = vector.shape_cast %8 : vector<1x16x128xf32> to vector<16x128xf32>
    %c19 = arith.constant 19 : index
    %c0_11 = arith.constant 0 : index
    %10 = vector.load %arg4[%c19, %c0_11] : memref<36x128xf32, #tpu.memory_space<vmem>>, vector<16x128xf32>
    tpu.vector_store %arg4[%c19, %c0_11], %9 {strides = array<i32>} : memref<36x128xf32, #tpu.memory_space<vmem>>, vector<16x128xf32>,
    %c0_12 = arith.constant 0 : index
    %c0_13 = arith.constant 0 : index
    %11 = vector.load %arg4[%c0_12, %c0_13] : memref<36x128xf32, #tpu.memory_space<vmem>>, vector<34x128xf32>
    %c1_14 = arith.constant 1 : index
    %c0_15 = arith.constant 0 : index
    %12 = vector.load %arg4[%c1_14, %c0_15] : memref<36x128xf32, #tpu.memory_space<vmem>>, vector<34x128xf32>
    %c2 = arith.constant 2 : index
    %c0_16 = arith.constant 0 : index
    %13 = vector.load %arg4[%c2, %c0_16] : memref<36x128xf32, #tpu.memory_space<vmem>>, vector<34x128xf32>
    %14 = tpu.concatenate %11, %12, %13 in 1 : vector<34x128xf32>, vector<34x128xf32>, vector<34x128xf32> -> vector<34x384xf32>
    %c0_17 = arith.constant 0 : index
    %c0_18 = arith.constant 0 : index
    %15 = vector.load %arg2[%c0_17, %c0_18] : memref<384x256xf32, #tpu.memory_space<vmem>>, vector<384x256xf32>
    %cst_19 = arith.constant dense<0.000000e+00> : vector<34x256xf32>
    %16 = tpu.matmul %14, %15, %cst_19 {dimension_numbers = #tpu.dot_dimension_numbers<[1], [0], [0], [1], [0, 0, 1, 1], [], []>} : vector<34x384xf32>, vector<384x256xf32>, vector<34x256xf32> -> vector<34x256xf32>
    %17 = vector.extract_strided_slice %16 {offsets = [0, 0], sizes = [16, 256], strides = [1, 1]} : vector<34x256xf32> to vector<16x256xf32>
    %c0_20 = arith.constant 0 : index
    %c0_21 = arith.constant 0 : index
    %c0_22 = arith.constant 0 : index
    %18 = vector.load %arg3[%c0_20, %c0_21, %c0_22] : memref<2x16x256xf32, #tpu.memory_space<vmem>>, vector<1x16x256xf32>
    %19 = vector.shape_cast %18 : vector<1x16x256xf32> to vector<16x256xf32>
    %20 = vector.shape_cast %17 : vector<16x256xf32> to vector<1x16x256xf32>
    tpu.vector_store %arg3[%c0_20, %c0_21, %c0_22], %20 {strides = array<i32>} : memref<2x16x256xf32, #tpu.memory_space<vmem>>, vector<1x16x256xf32>,
    %21 = vector.extract_strided_slice %16 {offsets = [18, 0], sizes = [16, 256], strides = [1, 1]} : vector<34x256xf32> to vector<16x256xf32>
    %c1_23 = arith.constant 1 : index
    %c0_24 = arith.constant 0 : index
    %c0_25 = arith.constant 0 : index
    %22 = vector.load %arg3[%c1_23, %c0_24, %c0_25] : memref<2x16x256xf32, #tpu.memory_space<vmem>>, vector<1x16x256xf32>
    %23 = vector.shape_cast %22 : vector<1x16x256xf32> to vector<16x256xf32>
    %24 = vector.shape_cast %21 : vector<16x256xf32> to vector<1x16x256xf32>
    tpu.vector_store %arg3[%c1_23, %c0_24, %c0_25], %24 {strides = array<i32>} : memref<2x16x256xf32, #tpu.memory_space<vmem>>, vector<1x16x256xf32>,
    return
  }
  func.func @transform_0(%arg0: i32) -> (i32, i32, i32) {
    %c0_i32 = arith.constant 0 : i32
    %c0_i32_0 = arith.constant 0 : i32
    %c0_i32_1 = arith.constant 0 : i32
    return %arg0, %c0_i32, %c0_i32_0 : i32, i32, i32
  }
  func.func @transform_1(%arg0: i32) -> (i32, i32) {
    %c0_i32 = arith.constant 0 : i32
    %c0_i32_0 = arith.constant 0 : i32
    %c0_i32_1 = arith.constant 0 : i32
    return %c0_i32, %c0_i32_0 : i32, i32
  }
  func.func @transform_2(%arg0: i32) -> (i32, i32, i32) {
    %c0_i32 = arith.constant 0 : i32
    %c0_i32_0 = arith.constant 0 : i32
    %c0_i32_1 = arith.constant 0 : i32
    return %arg0, %c0_i32, %c0_i32_0 : i32, i32, i32
  }
}

</mosaic_0001>

<bundles_post_ra>
// kernel: fwd.1
= control target key start
LH: loop header
LB: loop body
LE: loop exit
PB: predicated region body
PF: predicated region fallthrough
CT: control target
= control target key end

     0   :  { %v472_v3 = vmov 0.0   ;;  %vm335_vm0 = vcmask 1045504   ;;  %s829_s1 = inlined_call_operand.vmem [shape: f32[384,256], index: 1, kind: input, shape index: {}]   ;;  %s830_s0 = inlined_call_operand.vmem [shape: f32[2,16,128], index: 0, kind: input, shape index: {}]   ;;  %s831_s2 = inlined_call_operand.vmem [shape: f32[2,16,256], index: 2, kind: output, shape index: {}]  }
   0x1   :  { %v40_v0 = vld [vmem:[%s829_s1 + $0x8] sm:$0xff]  ;;  %v42_v1 = vld [vmem:[%s829_s1 + $0x18] sm:$0xff]  ;;  %v39_v2 = vld [vmem:[%s829_s1] sm:$0xff]  ;;  %294 = vmatprep.mubr.f32.mxu0 %v472_v3  ;;  %11 = vst [vmem:[#allocation2] sm:$0x1] %v472_v3 }
   0x2   :  { %12 = vst [vmem:[#allocation2 + $0x11] sm:$0x1] %v472_v3  ;;  %17 = vst [vmem:[#allocation2 + $0x12] sm:$0x1] %v472_v3  ;;  %v365_v4 = vpack.c.bf16 %v42_v1, %v40_v0  ;;  %v41_v5 = vld [vmem:[%s829_s1 + $0x10] sm:$0xff]  ;;  %v44_v6 = vld [vmem:[%s829_s1 + $0x28] sm:$0xff] }
   0x3   :  { %18 = vst [vmem:[#allocation2 + $0x23] sm:$0x1] %v472_v3  ;;  %v46_v7 = vld [vmem:[%s829_s1 + $0x38] sm:$0xff]  ;;  %v367_v8 = vpack.c.bf16 %v41_v5, %v39_v2  ;;  %v43_v10 = vld [vmem:[%s829_s1 + $0x20] sm:$0xff]  ;;  %v45_v11 = vld [vmem:[%s829_s1 + $0x30] sm:$0xff] }
   0x4   :  { %v369_v9 = vpack.c.bf16 %v46_v7, %v44_v6  ;;  %v48_v12 = vld [vmem:[%s829_s1 + $0x48] sm:$0xff]  ;;  %366 = vmatprep.subr.bf16.mxu1 %v365_v4  ;;  %v50_v13 = vld [vmem:[%s829_s1 + $0x58] sm:$0xff]  ;;  %v371_v14 = vpack.c.bf16 %v45_v11, %v43_v10  ;;  %v47_v16 = vld [vmem:[%s829_s1 + $0x40] sm:$0xff] }
   0x5   :  { %368 = vmatpush1.bf16.msra.mxu1 %v367_v8  ;;  %v373_v15 = vpack.c.bf16 %v50_v13, %v48_v12  ;;  %v49_v17 = vld [vmem:[%s829_s1 + $0x50] sm:$0xff]  ;;  %v52_v18 = vld [vmem:[%s829_s1 + $0x68] sm:$0xff]  ;;  %v54_v19 = vld [vmem:[%s829_s1 + $0x78] sm:$0xff] }
   0x6   :  { %370 = vmatprep.subr.bf16.mxu1 %v369_v9  ;;  %v375_v20 = vpack.c.bf16 %v49_v17, %v47_v16  ;;  %v377_v21 = vpack.c.bf16 %v54_v19, %v52_v18  ;;  %v51_v22 = vld [vmem:[%s829_s1 + $0x60] sm:$0xff]  ;;  %v53_v23 = vld [vmem:[%s829_s1 + $0x70] sm:$0xff]  ;;  %v56_v24 = vld [vmem:[%s829_s1 + $0x88] sm:$0xff] }
   0x7   :  { %v58_v25 = vld [vmem:[%s829_s1 + $0x98] sm:$0xff]  ;;  %v104_v26 = vld [vmem:[%s829_s1 + $0x208] sm:$0xff]  ;;  %v379_v28 = vpack.c.bf16 %v53_v23, %v51_v22  ;;  %v55_v29 = vld [vmem:[%s829_s1 + $0x80] sm:$0xff] }
   0x8   :  { %v106_v27 = vld [vmem:[%s829_s1 + $0x218] sm:$0xff]  ;;  %v103_v31 = vld [vmem:[%s829_s1 + $0x200] sm:$0xff]  ;;  %v105_v32 = vld [vmem:[%s829_s1 + $0x210] sm:$0xff]  ;;  %v381_v33 = vpack.c.bf16 %v58_v25, %v56_v24 }
   0x9   :  { %372 = vmatpush1.bf16.msra.mxu1 %v371_v14  ;;  %v429_v30 = vpack.c.bf16 %v106_v27, %v104_v26  ;;  %v57_v34 = vld [vmem:[%s829_s1 + $0x90] sm:$0xff]  ;;  %v431_v35 = vpack.c.bf16 %v105_v32, %v103_v31  ;;  %v108_v36 = vld [vmem:[%s829_s1 + $0x228] sm:$0xff]  ;;  %v110_v37 = vld [vmem:[%s829_s1 + $0x238] sm:$0xff] }
   0xa   :  { %374 = vmatprep.subr.bf16.mxu1 %v373_v15  ;;  %v60_v38 = vld [vmem:[%s829_s1 + $0xa8] sm:$0xff]  ;;  %v62_v39 = vld [vmem:[%s829_s1 + $0xb8] sm:$0xff]  ;;  %v433_v40 = vpack.c.bf16 %v110_v37, %v108_v36  ;;  %v107_v41 = vld [vmem:[%s829_s1 + $0x220] sm:$0xff]  ;;  %v383_v43 = vpack.c.bf16 %v57_v34, %v55_v29 }
   0xb   :  { %430 = vmatprep.subr.bf16.mxu0 %v429_v30  ;;  %v109_v42 = vld [vmem:[%s829_s1 + $0x230] sm:$0xff]  ;;  %v59_v44 = vld [vmem:[%s829_s1 + $0xa0] sm:$0xff]  ;;  %v112_v46 = vld [vmem:[%s829_s1 + $0x248] sm:$0xff]  ;;  %v385_v48 = vpack.c.bf16 %v62_v39, %v60_v38 }
   0xc   :  { %432 = vmatpush1.bf16.msra.mxu0 %v431_v35  ;;  %v435_v45 = vpack.c.bf16 %v109_v42, %v107_v41  ;;  %v114_v47 = vld [vmem:[%s829_s1 + $0x258] sm:$0xff]  ;;  %v61_v49 = vld [vmem:[%s829_s1 + $0xb0] sm:$0xff]  ;;  %v111_v51 = vld [vmem:[%s829_s1 + $0x240] sm:$0xff] }
   0xd   :  { %376 = vmatpush1.bf16.msra.mxu1 %v375_v20  ;;  %434 = vmatprep.subr.bf16.mxu0 %v433_v40  ;;  %v437_v50 = vpack.c.bf16 %v114_v47, %v112_v46  ;;  %v113_v52 = vld [vmem:[%s829_s1 + $0x250] sm:$0xff]  ;;  %v64_v53 = vld [vmem:[%s829_s1 + $0xc8] sm:$0xff]  ;;  %v66_v54 = vld [vmem:[%s829_s1 + $0xd8] sm:$0xff]  ;;  %v387_v58 = vpack.c.bf16 %v61_v49, %v59_v44 }
   0xe   :  { %378 = vmatprep.subr.bf16.mxu1 %v377_v21  ;;  %v116_v55 = vld [vmem:[%s829_s1 + $0x268] sm:$0xff]  ;;  %v439_v56 = vpack.c.bf16 %v113_v52, %v111_v51  ;;  %v118_v57 = vld [vmem:[%s829_s1 + $0x278] sm:$0xff]  ;;  %v63_v59 = vld [vmem:[%s829_s1 + $0xc0] sm:$0xff]  ;;  %v389_v63 = vpack.c.bf16 %v66_v54, %v64_v53 }
   0xf   :  { %v441_v60 = vpack.c.bf16 %v118_v57, %v116_v55  ;;  %v115_v61 = vld [vmem:[%s829_s1 + $0x260] sm:$0xff]  ;;  %v117_v62 = vld [vmem:[%s829_s1 + $0x270] sm:$0xff]  ;;  %v120_v1 = vld [vmem:[%s829_s1 + $0x288] sm:$0xff] }
  0x10   :  { %436 = vmatpush1.bf16.msra.mxu0 %v435_v45  ;;  %v65_v0 = vld [vmem:[%s829_s1 + $0xd0] sm:$0xff]  ;;  %v122_v2 = vld [vmem:[%s829_s1 + $0x298] sm:$0xff]  ;;  %v68_v4 = vld [vmem:[%s829_s1 + $0xe8] sm:$0xff]  ;;  %v443_v6 = vpack.c.bf16 %v117_v62, %v115_v61 }
  0x11   :  { %380 = vmatpush1.bf16.msra.mxu1 %v379_v28  ;;  %438 = vmatprep.subr.bf16.mxu0 %v437_v50  ;;  %v70_v5 = vld [vmem:[%s829_s1 + $0xf8] sm:$0xff]  ;;  %v391_v7 = vpack.c.bf16 %v65_v0, %v63_v59  ;;  %v67_v8 = vld [vmem:[%s829_s1 + $0xe0] sm:$0xff]  ;;  %v445_v9 = vpack.c.bf16 %v122_v2, %v120_v1  ;;  %v121_v11 = vld [vmem:[%s829_s1 + $0x290] sm:$0xff] }
  0x12   :  { %382 = vmatprep.subr.bf16.mxu1 %v381_v33  ;;  %v119_v10 = vld [vmem:[%s829_s1 + $0x280] sm:$0xff]  ;;  %v393_v12 = vpack.c.bf16 %v70_v5, %v68_v4  ;;  %v69_v13 = vld [vmem:[%s829_s1 + $0xf0] sm:$0xff]  ;;  %v124_v14 = vld [vmem:[%s829_s1 + $0x2a8] sm:$0xff] }
  0x13   :  { %v126_v15 = vld [vmem:[%s829_s1 + $0x2b8] sm:$0xff]  ;;  %v72_v16 = vld [vmem:[%s829_s1 + $0x108] sm:$0xff]  ;;  %v447_v18 = vpack.c.bf16 %v121_v11, %v119_v10  ;;  %v395_v19 = vpack.c.bf16 %v69_v13, %v67_v8  ;;  %v71_v20 = vld [vmem:[%s829_s1 + $0x100] sm:$0xff] }
  0x14   :  { %440 = vmatpush1.bf16.msra.mxu0 %v439_v56  ;;  %v74_v17 = vld [vmem:[%s829_s1 + $0x118] sm:$0xff]  ;;  %v449_v21 = vpack.c.bf16 %v126_v15, %v124_v14  ;;  %v123_v22 = vld [vmem:[%s829_s1 + $0x2a0] sm:$0xff]  ;;  %v125_v23 = vld [vmem:[%s829_s1 + $0x2b0] sm:$0xff] }
  0x15   :  { %384 = vmatpush1.bf16.msra.mxu1 %v383_v43  ;;  %442 = vmatprep.subr.bf16.mxu0 %v441_v60  ;;  %v397_v24 = vpack.c.bf16 %v74_v17, %v72_v16  ;;  %v73_v25 = vld [vmem:[%s829_s1 + $0x110] sm:$0xff]  ;;  %v128_v26 = vld [vmem:[%s829_s1 + $0x2c8] sm:$0xff]  ;;  %v130_v27 = vld [vmem:[%s829_s1 + $0x2d8] sm:$0xff]  ;;  %v451_v32 = vpack.c.bf16 %v125_v23, %v123_v22 }
  0x16   :  { %386 = vmatprep.subr.bf16.mxu1 %v385_v48  ;;  %v76_v28 = vld [vmem:[%s829_s1 + $0x128] sm:$0xff]  ;;  %v78_v29 = vld [vmem:[%s829_s1 + $0x138] sm:$0xff]  ;;  %v75_v30 = vld [vmem:[%s829_s1 + $0x120] sm:$0xff]  ;;  %v399_v35 = vpack.c.bf16 %v73_v25, %v71_v20  ;;  %v453_v36 = vpack.c.bf16 %v130_v27, %v128_v26 }
  0x17   :  { %v77_v31 = vld [vmem:[%s829_s1 + $0x130] sm:$0xff]  ;;  %v127_v33 = vld [vmem:[%s829_s1 + $0x2c0] sm:$0xff]  ;;  %v703_v38 = vld [vmem:[%s830_s0 + $0x8] sm:$0xff]  ;;  %v401_v40 = vpack.c.bf16 %v78_v29, %v76_v28 }
  0x18   :  { %444 = vmatpush1.bf16.msra.mxu0 %v443_v6  ;;  %v129_v34 = vld [vmem:[%s829_s1 + $0x2d0] sm:$0xff]  ;;  %v13_v37 = vld [vmem:[%s830_s0] sm:$0xff]  ;;  %v132_v41 = vld [vmem:[%s829_s1 + $0x2e8] sm:$0xff]  ;;  %16 = vst [vmem:[#allocation2 + $0x9] sm:$0xff] %v703_v38  ;;  %v403_v47 = vpack.c.bf16 %v77_v31, %v75_v30 }
  0x19   :  { %388 = vmatpush1.bf16.msra.mxu1 %v387_v58  ;;  %446 = vmatprep.subr.bf16.mxu0 %v445_v9  ;;  %v359_v39 = vld [vmem:[%s830_s0 + $0x10] sm:$0xff]  ;;  %v134_v42 = vld [vmem:[%s829_s1 + $0x2f8] sm:$0xff]  ;;  %15 = vst [vmem:[#allocation2 + $0x1] sm:$0xff] %v13_v37  ;;  %v80_v44 = vld [vmem:[%s829_s1 + $0x148] sm:$0xff]  ;;  %v455_v46 = vpack.c.bf16 %v129_v34, %v127_v33 }
  0x1a   :  { %390 = vmatprep.subr.bf16.mxu1 %v389_v63  ;;  %199 = vmatprep.mubr.f32.mxu1 %v13_v37  ;;  %22 = vst [vmem:[#allocation2 + $0x13] sm:$0xff] %v359_v39  ;;  %v360_v43 = vld [vmem:[%s830_s0 + $0x18] sm:$0xff]  ;;  %v457_v48 = vpack.c.bf16 %v134_v42, %v132_v41  ;;  %v131_v49 = vld [vmem:[%s829_s1 + $0x2e0] sm:$0xff]  ;;  %v133_v50 = vld [vmem:[%s829_s1 + $0x2f0] sm:$0xff] }
  0x1b   :  { %v82_v45 = vld [vmem:[%s829_s1 + $0x158] sm:$0xff]  ;;  %23 = vst [vmem:[#allocation2 + $0x1b] sm:$0xff] %v360_v43  ;;  %v79_v52 = vld [vmem:[%s829_s1 + $0x140] sm:$0xff]  ;;  %v81_v53 = vld [vmem:[%s829_s1 + $0x150] sm:$0xff]  ;;  %v459_v56 = vpack.c.bf16 %v133_v50, %v131_v49 }
  0x1c   :  { %448 = vmatpush1.bf16.msra.mxu0 %v447_v18  ;;  %v405_v51 = vpack.c.bf16 %v82_v45, %v80_v44  ;;  %v84_v54 = vld [vmem:[%s829_s1 + $0x168] sm:$0xff]  ;;  %v86_v55 = vld [vmem:[%s829_s1 + $0x178] sm:$0xff]  ;;  %v407_v57 = vpack.c.bf16 %v81_v53, %v79_v52  ;;  %v83_v59 = vld [vmem:[%s829_s1 + $0x160] sm:$0xff] }
  0x1d   :  { %392 = vmatpush1.bf16.msra.mxu1 %v391_v7  ;;  %450 = vmatprep.subr.bf16.mxu0 %v449_v21  ;;  %v409_v58 = vpack.c.bf16 %v86_v55, %v84_v54  ;;  %v85_v60 = vld [vmem:[%s829_s1 + $0x170] sm:$0xff]  ;;  %v88_v61 = vld [vmem:[%s829_s1 + $0x188] sm:$0xff]  ;;  %v90_v62 = vld [vmem:[%s829_s1 + $0x198] sm:$0xff] }
  0x1e   :  { %394 = vmatprep.subr.bf16.mxu1 %v393_v12  ;;  %v411_v0 = vpack.c.bf16 %v85_v60, %v83_v59  ;;  %v413_v1 = vpack.c.bf16 %v90_v62, %v88_v61  ;;  %v87_v2 = vld [vmem:[%s829_s1 + $0x180] sm:$0xff]  ;;  %v89_v4 = vld [vmem:[%s829_s1 + $0x190] sm:$0xff]  ;;  %v92_v5 = vld [vmem:[%s829_s1 + $0x1a8] sm:$0xff] }
  0x1f   :  { %v94_v6 = vld [vmem:[%s829_s1 + $0x1b8] sm:$0xff]  ;;  %v35_v7 = vld [vmem:[#allocation2 + $0xa] sm:$0xff]  ;;  %v415_v8 = vpack.c.bf16 %v89_v4, %v87_v2  ;;  %v91_v10 = vld [vmem:[%s829_s1 + $0x1a0] sm:$0xff] }
  0x20   :  { %452 = vmatpush1.bf16.msra.mxu0 %v451_v32  ;;  %v34_v63 = vld [vmem:[#allocation2 + $0x2] sm:$0xff]  ;;  %v417_v9 = vpack.c.bf16 %v94_v6, %v92_v5  ;;  %v93_v11 = vld [vmem:[%s829_s1 + $0x1b0] sm:$0xff]  ;;  %v98_v13 = vld [vmem:[%s829_s1 + $0x1d8] sm:$0xff] }
  0x21   :  { %396 = vmatpush1.bf16.msra.mxu1 %v395_v19  ;;  %454 = vmatprep.subr.bf16.mxu0 %v453_v36  ;;  %v96_v12 = vld [vmem:[%s829_s1 + $0x1c8] sm:$0xff]  ;;  %v36_v14 = vld [vmem:[#allocation2 + $0x12] sm:$0xff]  ;;  %v419_v15 = vpack.c.bf16 %v93_v11, %v91_v10  ;;  %v95_v17 = vld [vmem:[%s829_s1 + $0x1c0] sm:$0xff] }
  0x22   :  { %398 = vmatprep.subr.bf16.mxu1 %v397_v24  ;;  %v421_v16 = vpack.c.bf16 %v98_v13, %v96_v12  ;;  %v97_v18 = vld [vmem:[%s829_s1 + $0x1d0] sm:$0xff]  ;;  %v100_v19 = vld [vmem:[%s829_s1 + $0x1e8] sm:$0xff]  ;;  %v102_v20 = vld [vmem:[%s829_s1 + $0x1f8] sm:$0xff] }
  0x23   :  { %v37_v21 = vld [vmem:[#allocation2 + $0x1a] sm:$0xff]  ;;  %v423_v22 = vpack.c.bf16 %v97_v18, %v95_v17  ;;  %v425_v23 = vpack.c.bf16 %v102_v20, %v100_v19  ;;  %v101_v25 = vld [vmem:[%s829_s1 + $0x1f0] sm:$0xff]  ;;  %v38_v26 = vld [vmem:[#allocation2 + $0x22] sm:$0x3] }
  0x24   :  { %456 = vmatpush1.bf16.msra.mxu0 %v455_v46  ;;  %v99_v24 = vld [vmem:[%s829_s1 + $0x1e0] sm:$0xff]  ;;  %v25_v29 = vld [vmem:[#allocation2 + $0x8] sm:$0xff]  ;;  %v31_v30 = vld [vmem:[#allocation2 + $0x11] sm:$0xff] }
  0x25   :  { %400 = vmatpush1.bf16.msra.mxu1 %v399_v35  ;;  %458 = vmatprep.subr.bf16.mxu0 %v457_v48  ;;  %v427_v27 = vpack.c.bf16 %v101_v25, %v99_v24  ;;  %v24_v28 = vld [vmem:[#allocation2] sm:$0xff]  ;;  %v26_v31 = vld [vmem:[#allocation2 + $0x10] sm:$0xff]  ;;  %v27_v33 = vld [vmem:[#allocation2 + $0x18] sm:$0xff] }
  0x26   :  { %402 = vmatprep.subr.bf16.mxu1 %v401_v40  ;;  %v32_v32 = vld [vmem:[#allocation2 + $0x19] sm:$0xff] }
  0x27   :  { %v28_v34 = vld [vmem:[#allocation2 + $0x20] sm:$0x3] }
  0x28   :  { %460 = vmatpush1.bf16.msra.mxu0 %v459_v56 }
  0x29   :  { %404 = vmatpush1.bf16.msra.mxu1 %v403_v47 }
  0x2a   :  { %406 = vmatprep.subr.bf16.mxu1 %v405_v51 }
  0x2b   :  { %295 = vmatmul.mubr.f32.vlgmr.msra.gmra.mrb[0].mxu0 %v34_v63 }
  0x2c   :  { %300 = vmatprep.mubr.f32.mxu0 %v472_v3 }
  0x2d   :  { %408 = vmatpush1.bf16.msra.mxu1 %v407_v57 }
  0x2e   :  { %410 = vmatprep.subr.bf16.mxu1 %v409_v58 }
  0x2f   :  { %301 = vmatmul.mubr.f32.gmra.mrb[2].mxu0 %v35_v7 }
  0x30   :  { %306 = vmatprep.mubr.f32.mxu0 %v472_v3 }
  0x31   :  { %412 = vmatpush1.bf16.msra.mxu1 %v411_v0 }
  0x32   :  { %414 = vmatprep.subr.bf16.mxu1 %v413_v1 }
  0x33   :  { %307 = vmatmul.mubr.f32.gmra.mrb[4].mxu0 %v36_v14 }
  0x34   :  { %312 = vmatprep.mubr.f32.mxu0 %v472_v3 }
  0x35   :  { %416 = vmatpush1.bf16.msra.mxu1 %v415_v8 }
  0x36   :  { %418 = vmatprep.subr.bf16.mxu1 %v417_v9 }
  0x37   :  { %313 = vmatmul.mubr.f32.gmra.mrb[6].mxu0 %v37_v21 }
  0x38   :  { %318 = vmatprep.mubr.f32.mxu0 %v472_v3  ;;  %v33_v3 = vld [vmem:[#allocation2 + $0x21] sm:$0x3] }
  0x39   :  { %420 = vmatpush1.bf16.msra.mxu1 %v419_v15 }
  0x3a   :  { %422 = vmatprep.subr.bf16.mxu1 %v421_v16 }
  0x3b   :  { %319 = vmatmul.mubr.f32.gmra.mrb[8].mxu0 %v38_v26 }
  0x3d   :  { %424 = vmatpush1.bf16.msra.mxu1 %v423_v22 }
  0x3e   :  { %426 = vmatprep.subr.bf16.mxu1 %v425_v23 }
  0x41   :  { %428 = vmatpush1.bf16.msra.mxu1 %v427_v27 }
  0x44   :  { %200 = vmatmul.mubr.f32.vlgmr.msra.gmra.mrb[0].mxu1 %v24_v28 }
  0x45   :  { %205 = vmatprep.mubr.f32.mxu1 %v703_v38 }
  0x48   :  { %206 = vmatmul.mubr.f32.gmra.mrb[2].mxu1 %v25_v29 }
  0x49   :  { %211 = vmatprep.mubr.f32.mxu1 %v31_v30 }
  0x4c   :  { %212 = vmatmul.mubr.f32.gmra.mrb[4].mxu1 %v26_v31 }
  0x4d   :  { %217 = vmatprep.mubr.f32.mxu1 %v32_v32 }
  0x50   :  { %218 = vmatmul.mubr.f32.gmra.mrb[6].mxu1 %v27_v33 }
  0x51   :  { %223 = vmatprep.mubr.f32.mxu1 %v33_v3 }
  0x54   :  { %224 = vmatmul.mubr.f32.gmra.mrb[8].mxu1 %v28_v34 }
  0xfe   :  { %v296_v35 = vpop.f32.mrb[0].mxu0 }
  0xff   :  { %v298_v36 = vpop.f32.mrb[1].mxu0 }
 0x102   :  { %v302_v37 = vpop.f32.mrb[2].mxu0 }
 0x103   :  { %v304_v39 = vpop.f32.mrb[3].mxu0 }
 0x106   :  { %v308_v40 = vpop.f32.mrb[4].mxu0 }
 0x107   :  { %v310_v38 = vpop.f32.mrb[5].mxu0 }
 0x10a   :  { %v314_v41 = vpop.f32.mrb[6].mxu0 }
 0x10b   :  { %v316_v42 = vpop.f32.mrb[7].mxu0 }
 0x10e   :  { %v320_v43 = vpop.f32.mrb[8].mxu0 }
 0x10f   :  { %v322_v44 = vpop.f32.mrb[9].mxu0 }
 0x117   :  { %v201_v45 = vpop.f32.mrb[0].mxu1 }
 0x118   :  { %v297_v46 = vadd.f32 %v296_v35, %v201_v45  ;;  %v203_v47 = vpop.f32.mrb[1].mxu1 }
 0x119   :  { %v299_v48 = vadd.f32 %v298_v36, %v203_v47 }
 0x11a   :  { %325 = vst [vmem:[%s831_s2] sm:$0xff] %v297_v46 }
 0x11b   :  { %326 = vst [vmem:[%s831_s2 + $0x8] sm:$0xff] %v299_v48  ;;  %v207_v49 = vpop.f32.mrb[2].mxu1 }
 0x11c   :  { %v303_v50 = vadd.f32 %v302_v37, %v207_v49  ;;  %v209_v51 = vpop.f32.mrb[3].mxu1 }
 0x11d   :  { %v305_v52 = vadd.f32 %v304_v39, %v209_v51 }
 0x11e   :  { %327 = vst [vmem:[%s831_s2 + $0x10] sm:$0xff] %v303_v50 }
 0x11f   :  { %328 = vst [vmem:[%s831_s2 + $0x18] sm:$0xff] %v305_v52  ;;  %v213_v53 = vpop.f32.mrb[4].mxu1 }
 0x120   :  { %v309_v54 = vadd.f32 %v308_v40, %v213_v53  ;;  %v215_v55 = vpop.f32.mrb[5].mxu1 }
 0x121   :  { %v311_v56 = vadd.f32 %v310_v38, %v215_v55 }
 0x122   :  { %v336_v61 = vrot.slane %v309_v54, 2 }
 0x123   :  { %v219_v57 = vpop.f32.mrb[6].mxu1  ;;  %v339_v63 = vrot.slane %v311_v56, 2 }
 0x124   :  { %v315_v58 = vadd.f32 %v314_v41, %v219_v57  ;;  %v221_v59 = vpop.f32.mrb[7].mxu1 }
 0x125   :  { %v317_v60 = vadd.f32 %v316_v42, %v221_v59 }
 0x126   :  { %v337_v62 = vrot.slane %v315_v58, 2 }
 0x127   :  { %v340_v0 = vrot.slane %v317_v60, 2  ;;  %v225_v1 = vpop.f32.mrb[8].mxu1 }
 0x128   :  { %v338_v2 = vsel %vm335_vm0, %v336_v61, %v337_v62  ;;  %v321_v4 = vadd.f32 %v320_v43, %v225_v1  ;;  %v227_v5 = vpop.f32.mrb[9].mxu1 }
 0x129   :  { %361 = vst [vmem:[%s831_s2 + $0x20] sm:$0xff] %v338_v2  ;;  %v341_v6 = vsel %vm335_vm0, %v339_v63, %v340_v0  ;;  %v323_v7 = vadd.f32 %v322_v44, %v227_v5 }
 0x12a   :  { %362 = vst [vmem:[%s831_s2 + $0x28] sm:$0xff] %v341_v6  ;;  %v342_v8 = vrot.slane %v321_v4, 2 }
 0x12b   :  { %v344_v9 = vrot.slane %v323_v7, 2 }
 0x12c   :  { %v343_v10 = vsel %vm335_vm0, %v337_v62, %v342_v8 }
 0x12d   :  { %363 = vst [vmem:[%s831_s2 + $0x30] sm:$0xff] %v343_v10  ;;  %v345_v11 = vsel %vm335_vm0, %v340_v0, %v344_v9 }
 0x12e   :  { %364 = vst [vmem:[%s831_s2 + $0x38] sm:$0xff] %v345_v11 }

</bundles_post_ra>
